<compile_context>
chip_gen: v6e
topology: v6e:2x2x1
jax: 0.10.0
libtpu: 0.0.40
codegen_flags: <defaults>
</compile_context>

<pallas_src>
import jax
import jax.numpy as jnp
from jax import lax
from jax.experimental import pallas as pl
from jax.experimental.pallas import tpu as pltpu


def _linear_softmax_kernel(x_ref, w_ref, b_ref, o_ref):
    # x_ref: (TB, F), w_ref: (C, F), b_ref: (1, C), o_ref: (TB, C)
    logits = lax.dot_general(
        x_ref[...], w_ref[...],
        dimension_numbers=(((1,), (1,)), ((), ())),   # contract F with F (RHS transposed on MXU)
        preferred_element_type=jnp.float32,
    ) + b_ref[...]
    # numerically-stable softmax over class axis (dim=1), matching nn.Softmax(dim=1)
    m = jnp.max(logits, axis=1, keepdims=True)
    e = jnp.exp(logits - m)
    denom = jnp.sum(e, axis=1, keepdims=True)
    # reciprocal runs on the EUP (its own VLIW slot); exact (approx=False) to hold 1e-5.
    o_ref[...] = (e * pl.reciprocal(denom, approx=False)).astype(o_ref.dtype)


def linear_multiclass_forward(x, weight, bias, *, tile_b=512):
    """x: [B, F] f32, weight: [C, F] f32 (PyTorch nn.Linear layout), bias: [C] f32."""
    B, F = x.shape
    C = weight.shape[0]
    b2 = bias.reshape(1, C)

    # Batch tile: multiple of 8 (sublane rule), capped at tile_b; 512 rows of
    # f32 x at F=32 is only 64 KiB/tile -> double-buffered it fits every
    # generation's VMEM (incl. v7x's 64 MiB) with huge headroom.
    tb = min(tile_b, max(8, ((B + 7) // 8) * 8))
    b_pad = ((B + tb - 1) // tb) * tb
    if b_pad != B:
        # Pad with zero rows; their (discarded) softmax output is well-defined.
        x_in = jnp.zeros((b_pad, F), x.dtype).at[:B].set(x)
    else:
        x_in = x

    out = pl.pallas_call(
        _linear_softmax_kernel,
        out_shape=jax.ShapeDtypeStruct((b_pad, C), jnp.float32),
        grid_spec=pltpu.PrefetchScalarGridSpec(
            num_scalar_prefetch=0,
            grid=(b_pad // tb,),
            in_specs=[
                pl.BlockSpec((tb, F), lambda i: (i, 0)),   # streamed, double-buffered
                pl.BlockSpec((C, F), lambda i: (0, 0)),    # VMEM-resident weight
                pl.BlockSpec((1, C), lambda i: (0, 0)),    # VMEM-resident bias
            ],
            out_specs=pl.BlockSpec((tb, C), lambda i: (i, 0)),
        ),
        compiler_params=pltpu.CompilerParams(
            dimension_semantics=("parallel",),   # lets v7x shard batch tiles across both TCs
        ),
        cost_estimate=pl.CostEstimate(
            flops=2 * b_pad * F * C,
            transcendentals=b_pad * C,
            bytes_accessed=(b_pad * F + C * F + C + b_pad * C) * 4,
        ),
    )(x_in, weight, b2)
    return out[:B]


def _reference(x, weight, bias):
    logits = x @ weight.T + bias
    return jax.nn.softmax(logits, axis=1)


if __name__ == "__main__":
    key = jax.random.PRNGKey(0)
    kx, kw, kb = jax.random.split(key, 3)

    B, F, C = 8, 32, 3  # batch, n_features, n_classes
    x = jax.random.normal(kx, (B, F), dtype=jnp.float32)

    # Deterministic parameter init (synthetic; mirrors nn.Linear(F, C) shapes:
    # weight [C, F], bias [C]).
    bound = 1.0 / jnp.sqrt(F)
    weight = jax.random.uniform(kw, (C, F), minval=-bound, maxval=bound,
                                dtype=jnp.float32)
    bias = jax.random.uniform(kb, (C,), minval=-bound, maxval=bound,
                              dtype=jnp.float32)

    out = linear_multiclass_forward(x, weight, bias)
    out = jax.block_until_ready(out)

    ref = _reference(x, weight, bias)
    assert out.shape == (B, C)
    assert jnp.allclose(out, ref, atol=1e-5, rtol=1e-5), "mismatch vs reference"
    assert jnp.allclose(jnp.sum(out, axis=1), 1.0, atol=1e-5), "rows must sum to 1"

    print("KERNEL_OK")
</pallas_src>

<mosaic_0001>
module attributes {stable_mosaic.version = 11 : i64} {
  func.func @_linear_softmax_kernel(%arg0: i32, %arg1: memref<8x32xf32, #tpu.memory_space<vmem>>, %arg2: memref<3x32xf32, #tpu.memory_space<vmem>>, %arg3: memref<1x3xf32, #tpu.memory_space<vmem>>, %arg4: memref<8x3xf32, #tpu.memory_space<vmem>>) attributes {dimension_semantics = [#tpu.dimension_semantics<parallel>], iteration_bounds = array<i64: 1>, scalar_prefetch = 0 : i64, scratch_operands = 0 : i64, tpu.core_type = #tpu.core_type<tc>, window_params = [{transform_indices = @transform_0, window_bounds = array<i64: 8, 32>}, {pipeline_mode = #tpu.pipeline_mode<synchronous>, transform_indices = @transform_1, window_bounds = array<i64: 3, 32>}, {pipeline_mode = #tpu.pipeline_mode<synchronous>, transform_indices = @transform_2, window_bounds = array<i64: 1, 3>}, {transform_indices = @transform_3, window_bounds = array<i64: 8, 3>}]} {
    %c0 = arith.constant 0 : index
    %c0_0 = arith.constant 0 : index
    %0 = vector.load %arg1[%c0, %c0_0] : memref<8x32xf32, #tpu.memory_space<vmem>>, vector<8x32xf32>
    %c0_1 = arith.constant 0 : index
    %c0_2 = arith.constant 0 : index
    %1 = vector.load %arg2[%c0_1, %c0_2] : memref<3x32xf32, #tpu.memory_space<vmem>>, vector<3x32xf32>
    %cst = arith.constant dense<0.000000e+00> : vector<8x3xf32>
    %2 = tpu.matmul %0, %1, %cst {dimension_numbers = #tpu.dot_dimension_numbers<[1], [1], [0], [0], [0, 0, 1, 0], [], []>} : vector<8x32xf32>, vector<3x32xf32>, vector<8x3xf32> -> vector<8x3xf32>
    %c0_3 = arith.constant 0 : index
    %c0_4 = arith.constant 0 : index
    %3 = vector.load %arg3[%c0_3, %c0_4] : memref<1x3xf32, #tpu.memory_space<vmem>>, vector<1x3xf32>
    %4 = vector.broadcast %3 : vector<1x3xf32> to vector<8x3xf32>
    %5 = arith.addf %2, %4 : vector<8x3xf32>
    %cst_5 = arith.constant dense<0xFF800000> : vector<8xf32>
    %6 = vector.multi_reduction <maximumf>, %5, %cst_5 [1] : vector<8x3xf32> to vector<8xf32>
    %7 = vector.shape_cast %6 : vector<8xf32> to vector<8x1xf32>
    %8 = vector.broadcast %7 : vector<8x1xf32> to vector<8x3xf32>
    %9 = arith.subf %5, %8 : vector<8x3xf32>
    %10 = math.exp %9 : vector<8x3xf32>
    %cst_6 = arith.constant dense<0.000000e+00> : vector<8xf32>
    %11 = vector.multi_reduction <add>, %10, %cst_6 [1] : vector<8x3xf32> to vector<8xf32>
    %12 = vector.shape_cast %11 : vector<8xf32> to vector<8x1xf32>
    %13 = tpu.reciprocal %12 : vector<8x1xf32> -> vector<8x1xf32>
    %14 = vector.broadcast %13 : vector<8x1xf32> to vector<8x3xf32>
    %15 = arith.mulf %10, %14 : vector<8x3xf32>
    %c0_7 = arith.constant 0 : index
    %c0_8 = arith.constant 0 : index
    %16 = vector.load %arg4[%c0_7, %c0_8] : memref<8x3xf32, #tpu.memory_space<vmem>>, vector<8x3xf32>
    tpu.vector_store %arg4[%c0_7, %c0_8], %15 {strides = array<i32>} : memref<8x3xf32, #tpu.memory_space<vmem>>, vector<8x3xf32>,
    return
  }
  func.func @transform_0(%arg0: i32) -> (i32, i32) {
    %c0_i32 = arith.constant 0 : i32
    %c0_i32_0 = arith.constant 0 : i32
    return %arg0, %c0_i32 : i32, i32
  }
  func.func @transform_1(%arg0: i32) -> (i32, i32) {
    %c0_i32 = arith.constant 0 : i32
    %c0_i32_0 = arith.constant 0 : i32
    %c0_i32_1 = arith.constant 0 : i32
    return %c0_i32, %c0_i32_0 : i32, i32
  }
  func.func @transform_2(%arg0: i32) -> (i32, i32) {
    %c0_i32 = arith.constant 0 : i32
    %c0_i32_0 = arith.constant 0 : i32
    %c0_i32_1 = arith.constant 0 : i32
    return %c0_i32, %c0_i32_0 : i32, i32
  }
  func.func @transform_3(%arg0: i32) -> (i32, i32) {
    %c0_i32 = arith.constant 0 : i32
    %c0_i32_0 = arith.constant 0 : i32
    return %arg0, %c0_i32 : i32, i32
  }
}

</mosaic_0001>

<bundles_post_ra>
// kernel: tpu_custom_call.1
= control target key start
LH: loop header
LB: loop body
LE: loop exit
PB: predicated region body
PF: predicated region fallthrough
CT: control target
= control target key end

     0   :  { %8 = vsyncpa [#allocation3], 0  ;;  %s244_s0 = inlined_call_operand.hbm [shape: f32[8,32], index: 0, kind: input, shape index: {}]   ;;  %s245_s1 = inlined_call_operand.hbm [shape: f32[3,32], index: 1, kind: input, shape index: {}]   ;;  %s246_s2 = inlined_call_operand.vmem [shape: f32[1,3], index: 2, kind: input, shape index: {}]   ;;  %s247_s3 = inlined_call_operand.vmem [shape: f32[8,3], index: 3, kind: output, shape index: {}]  }
   0x1   :  { %9 = vsyncpa [#allocation5], 0  ;;  %s205_s12 = smov [#allocation2]   ;;  %s206_s14 = smov [#allocation4]  }
   0x2   :  { %s16_s13 = sshll.u32 %s205_s12, 4  ;;  %s26_s15 = sshll.u32 %s206_s14, 4  ;;  %s17_s13 = int_to_ptr.vmem [resolvable:$true] %s16_s13  ;;  %s27_s15 = int_to_ptr.vmem [resolvable:$true] %s26_s15 }
   0x3   :  { %s169_s16 = scalar_lea.vmem %s17_s13, 128  ;;  %p174_p1 = scmp.lt.s32.totalorder %s17_s13, %s17_s13 }
   0x4   :  { %p170_p0 = scmp.ne.s32.totalorder %s17_s13, %s169_s16  ;;  %p175_p2 = scmp.lt.s32.totalorder %s169_s16, %s169_s16 }
   0x6   :  { %p176_p3 = por %p175_p2, %p174_p1 }
   0x8   :  { %p177_p4 = pnand %p176_p3, %p170_p0 }
   0xa   :  { %180 = shalt.err (!%p177_p4)
}
   0xb   :  { %19 = dma.hbm_to_vmem [thread:$0]  %s244_s0, 128, %s17_s13, [#allocation3]  }
   0xc   :  { %s189_s19 = scalar_lea.vmem %s27_s15, 64  ;;  %p194_p6 = scmp.lt.s32.totalorder %s27_s15, %s27_s15 }
   0xd   :  { %p190_p5 = scmp.ne.s32.totalorder %s27_s15, %s189_s19  ;;  %p195_p7 = scmp.lt.s32.totalorder %s189_s19, %s189_s19 }
   0xf   :  { %p196_p8 = por %p195_p7, %p194_p6 }
  0x11   :  { %p197_p9 = pnand %p196_p8, %p190_p5 }
  0x13   :  { %200 = shalt.err (!%p197_p9)
}
  0x14   :  { %29 = dma.hbm_to_vmem [thread:$0]  %s245_s1, 64, %s27_s15, [#allocation5]  }
  0x15   :  { %201 = dma.done.wait [#allocation3], 128  }
  0x16   :  { %202 = vsyncadd [#allocation3], 4294967168 }
  0x17   :  { %203 = dma.done.wait [#allocation5], 64  }
  0x18   :  { %204 = vsyncadd [#allocation5], 4294967232  ;;  %v207_v0 = vmov 0.0   ;;  %vm208_vm0 = vmmov 0   ;;  %vm47_vm1 = vcmask 261120   ;;  %v38_v2 = vld [vmem:[#allocation2] sm:$0xff] }
  0x19   :  { %148 = vmatprep.subr.mxu0 %v207_v0  ;;  %150 = vmatprep.mubr.msk.f32.mxu0 %vm208_vm0, %v207_v0  ;;  %v39_v1 = vld [vmem:[#allocation4] sm:$0x7]  ;;  %v143_v3 = vld [vmem:[%s246_s2] ss:$0 sm:$0xff]  ;;  %vm124_vm2 = vcmask 23552  }
  0x1a   :  { %149 = vmatpush3.xpose.msk.msra.mxu0 %vm47_vm1, %v39_v1 }
  0x1d   :  { %151 = vmatmul.mubr.msk.f32.vlgmr.msra.gmra.mxu0 %vm47_vm1, %v38_v2 }
  0xdd   :  { %v120_v4 = vpop.f32.mrf.mxu0 }
  0xde   :  { %v121_v5 = vadd.f32 %v143_v3, %v120_v4 }
  0xdf   :  { %v152_v6 = vpop.f32.mrf.mxu0 }
  0xe0   :  { %v125_v7 = vsel %vm124_vm2, %v121_v5, -inf }
  0xe1   :  { %126 = vmax.xlane.f32.xlu0 %v125_v7 }
 0x16a   :  { %v127_v8 = vpop.xlane.xlu0 %126 }
 0x16b   :  { %v128_v9 = vsub.f32 %v121_v5, %v127_v8 }
 0x16d   :  { %v129_v10 = vmul.f32 1.442695, %v128_v9 }
 0x16f   :  { %157 = vpow2.f32 %v129_v10 }
 0x17c   :  { %v158_v11 = vpop.eup %157 }
 0x17d   :  { %v131_v12 = vsel %vm124_vm2, %v158_v11, 0.0 }
 0x17e   :  { %132 = vadd.xlane.f32.xlu0 %v131_v12 }
 0x207   :  { %v133_v13 = vpop.xlane.xlu0 %132 }
 0x208   :  { %159 = vrcp.f32 %v133_v13 }
 0x215   :  { %v160_v14 = vpop.eup %159 }
 0x216   :  { %v135_v15 = vmul.f32 %v160_v14, %v158_v11 }
 0x218   :  { %136 = vst.msk [vmem:[%s247_s3] sm:$0xff] %vm124_vm2, %v135_v15 }
 0x219   :  { %141 = vsyncpa [#allocation3], 1 }
 0x21a   :  { %142 = vsyncpa [#allocation5], 1 }

</bundles_post_ra>
